<compile_context>
chip_gen: v6e
topology: v6e:2x2x1
jax: 0.10.0
libtpu: 0.0.40
codegen_flags: <defaults>
</compile_context>

<pallas_src>
import functools

import jax
import jax.numpy as jnp
from jax.experimental import pallas as pl
from jax.experimental.pallas import tpu as pltpu


# ---------------------------------------------------------------------------
# Small helpers
# ---------------------------------------------------------------------------
def _round_up(x, m):
    return ((x + m - 1) // m) * m


def _vmem_budget_bytes():
    """Generation-aware scoped-VMEM budget (v5e/v6e: 128 MiB, v7x: 64 MiB)."""
    cap = 64 * 1024 * 1024                        # conservative default (v7x)
    try:
        cap = int(pltpu.get_tpu_info().vmem_capacity_bytes)
    except Exception:
        pass
    return (cap * 3) // 4                         # headroom for buffers/spills


def _pick_row_tile(n_pad, max_block_bytes=8 * 1024 * 1024):
    """Largest row-strip height (multiple of 8, divides n_pad) whose bf16
    (tile_m, n_pad) A strip stays under max_block_bytes (double-buffered by
    the pipeline)."""
    cap = max(8, min(n_pad, max_block_bytes // (2 * n_pad)))
    best, t = 8, 8
    while t <= cap:
        if n_pad % t == 0:
            best = t
        t += 8
    return best


def make_dropout_mask(rng, n_pad, hidden, p):
    """F.dropout keep-mask with the 1/(1-p) scale folded in (f32)."""
    if p <= 0.0:
        return jnp.ones((n_pad, hidden), jnp.float32)
    keep = jax.random.bernoulli(rng, 1.0 - p, (n_pad, hidden))
    return keep.astype(jnp.float32) / (1.0 - p)


def build_norm_adj(edge_index, edge_weight, n, n_pad):
    """PyG gcn_norm as a dense (n_pad, n_pad) f32 matrix:
    A_hat = D^-1/2 (A + I) D^-1/2, built directly at padded size with one
    scatter (self-loops folded in) and one fused row/col scaling pass.
    Padded rows/columns are exactly zero."""
    src, dst = edge_index[0], edge_index[1]
    loop = jnp.arange(n, dtype=src.dtype)
    rows = jnp.concatenate([dst, loop])           # messages flow src -> dst
    cols = jnp.concatenate([src, loop])
    vals = jnp.concatenate([edge_weight.astype(jnp.float32),
                            jnp.ones((n,), jnp.float32)])
    a = jnp.zeros((n_pad, n_pad), jnp.float32).at[rows, cols].add(vals)
    deg = jnp.sum(a, axis=1)
    dinv = jnp.where(deg > 0, jax.lax.rsqrt(deg), 0.0)
    return a * (dinv[:, None] * dinv[None, :])


# ---------------------------------------------------------------------------
# Shared head math (masked softmax over nodes, masked mean pool, activ2)
# ---------------------------------------------------------------------------
def _head_compute(c, h2, wa, ba, n_valid):
    """c: (n_pad, 1) f32 node scores, h2: (n_pad, hidden), wa: (hidden, 1),
    ba: (1, 1).  Padded rows are masked here (no wrapper-side slicing of c or
    h2, and robust even if biases were non-zero)."""
    n_pad = c.shape[0]
    h2 = h2.astype(jnp.float32)

    node = jax.lax.broadcasted_iota(jnp.int32, (n_pad, 1), 0)
    c = jnp.where(node < n_valid, c, -jnp.inf)
    c = c - jnp.max(c, axis=0, keepdims=True)
    e = jnp.exp(c)
    choice = e / jnp.sum(e, axis=0, keepdims=True)             # (n_pad, 1)

    rows = jax.lax.broadcasted_iota(jnp.int32, h2.shape, 0)
    h2m = jnp.where(rows < n_valid, h2, 0.0)
    v = jnp.sum(h2m, axis=0, keepdims=True) * (1.0 / n_valid)  # (1, hidden)
    value = jnp.dot(v, wa, preferred_element_type=jnp.float32) + ba  # (1, 1)
    return choice, value


# ---------------------------------------------------------------------------
# Fused path: A_hat resident in VMEM, all three layers + head in one kernel
# ---------------------------------------------------------------------------
def _fused_gnn_kernel(a_ref, x_ref, w1_ref, b1_ref, w2_ref, b2_ref,
                      w3_ref, b3_ref, wa_ref, ba_ref, mask_ref,
                      choice_ref, value_ref, *, n_valid):
    a = a_ref[...]                                 # (n_pad, n_pad) bf16 resident

    # conv1 + ReLU + dropout
    ax = jnp.dot(a, x_ref[...], preferred_element_type=jnp.float32)
    h1 = jnp.dot(ax, w1_ref[...], preferred_element_type=jnp.float32) + b1_ref[...]
    h1 = jnp.maximum(h1, 0.0) * mask_ref[...]      # mask carries 1/(1-p)

    # conv2 + ReLU
    ah1 = jnp.dot(a, h1.astype(jnp.bfloat16), preferred_element_type=jnp.float32)
    h2 = jnp.dot(ah1, w2_ref[...], preferred_element_type=jnp.float32) + b2_ref[...]
    h2 = jnp.maximum(h2, 0.0)

    # conv3 -> per-node score (stays in VMEM; never written to HBM)
    ah2 = jnp.dot(a, h2.astype(jnp.bfloat16), preferred_element_type=jnp.float32)
    c = jnp.dot(ah2, w3_ref[...], preferred_element_type=jnp.float32) + b3_ref[...]

    # head: masked softmax over nodes + masked mean pool + activ2 (in-kernel)
    choice, value = _head_compute(c, h2, wa_ref[...], ba_ref[...], n_valid)
    # (n_pad, 1) is a tiny one-time store; lane-density is irrelevant here
    # because the whole conv3/head pipeline never touches HBM.
    choice_ref[...] = choice
    value_ref[...] = value


def _fused_forward(a_bf16, x_bf16, params, drop_mask, n_valid, vmem_limit):
    n_pad = a_bf16.shape[0]
    vmem = pl.BlockSpec(memory_space=pltpu.MemorySpace.VMEM)
    kernel = functools.partial(_fused_gnn_kernel, n_valid=n_valid)
    return pl.pallas_call(
        kernel,
        out_shape=(jax.ShapeDtypeStruct((n_pad, 1), jnp.float32),
                   jax.ShapeDtypeStruct((1, 1), jnp.float32)),
        in_specs=[vmem] * 11,
        out_specs=(vmem, vmem),
        compiler_params=pltpu.CompilerParams(vmem_limit_bytes=vmem_limit),
    )(a_bf16, x_bf16, params["w1"], params["b1"], params["w2"], params["b2"],
      params["w3"], params["b3"], params["wa"], params["ba"], drop_mask)


# ---------------------------------------------------------------------------
# Streaming fallback: one call per layer, full-width A row strips, resident H
# ---------------------------------------------------------------------------
def _gcn_layer_kernel(a_ref, h_ref, w_ref, b_ref, *rest, do_relu, do_dropout):
    if do_dropout:
        mask_ref, o_ref = rest
    else:
        (o_ref,) = rest
    # (tile_m, n_pad) bf16 strip of A @ resident H -> f32, then the tiny
    # feature transform.  Full-width strip => no reduction grid axis and no
    # accumulator scratch.
    acc = jnp.dot(a_ref[...], h_ref[...], preferred_element_type=jnp.float32)
    out = jnp.dot(acc, w_ref[...], preferred_element_type=jnp.float32) + b_ref[...]
    if do_relu:
        out = jnp.maximum(out, 0.0)
    if do_dropout:
        out = out * mask_ref[...]
    o_ref[...] = out.astype(o_ref.dtype)
    # NOTE: for conv3 (f_out == 1) this store is lane-masked, but it moves only
    # tile_m * 4 bytes per step — noise next to the ~8 MiB A strip per step.


def _gcn_layer_stream(a_bf16, h, w, b, *, relu, mask=None,
                      out_dtype=jnp.bfloat16, tile_m, vmem_limit):
    n_pad = a_bf16.shape[0]
    f_in, f_out = w.shape
    in_specs = [
        pl.BlockSpec((tile_m, n_pad), lambda i: (i, 0)),   # A strip (streamed)
        pl.BlockSpec((n_pad, f_in), lambda i: (0, 0)),     # H (fully resident)
        pl.BlockSpec((f_in, f_out), lambda i: (0, 0)),     # W (resident)
        pl.BlockSpec((1, f_out), lambda i: (0, 0)),        # bias (resident)
    ]
    args = [a_bf16, h, w, b]
    if mask is not None:
        in_specs.append(pl.BlockSpec((tile_m, f_out), lambda i: (i, 0)))
        args.append(mask)
    kernel = functools.partial(_gcn_layer_kernel, do_relu=relu,
                               do_dropout=mask is not None)
    return pl.pallas_call(
        kernel,
        grid=(n_pad // tile_m,),
        in_specs=in_specs,
        out_specs=pl.BlockSpec((tile_m, f_out), lambda i: (i, 0)),
        out_shape=jax.ShapeDtypeStruct((n_pad, f_out), out_dtype),
        compiler_params=pltpu.CompilerParams(
            dimension_semantics=("parallel",),
            vmem_limit_bytes=vmem_limit),
    )(*args)


def _head_kernel(c_ref, h2_ref, wa_ref, ba_ref, choice_ref, value_ref, *,
                 n_valid):
    choice, value = _head_compute(c_ref[...], h2_ref[...],
                                  wa_ref[...], ba_ref[...], n_valid)
    choice_ref[...] = choice
    value_ref[...] = value


def _streaming_forward(a_bf16, x_bf16, params, drop_mask, n_valid, vmem_limit):
    n_pad = a_bf16.shape[0]
    tile_m = _pick_row_tile(n_pad)
    layer = functools.partial(_gcn_layer_stream, tile_m=tile_m,
                              vmem_limit=vmem_limit)
    h1 = layer(a_bf16, x_bf16, params["w1"], params["b1"], relu=True,
               mask=drop_mask)
    h2 = layer(a_bf16, h1, params["w2"], params["b2"], relu=True)
    c = layer(a_bf16, h2, params["w3"], params["b3"], relu=False,
              out_dtype=jnp.float32)
    vmem = pl.BlockSpec(memory_space=pltpu.MemorySpace.VMEM)
    return pl.pallas_call(
        functools.partial(_head_kernel, n_valid=n_valid),
        out_shape=(jax.ShapeDtypeStruct((n_pad, 1), jnp.float32),
                   jax.ShapeDtypeStruct((1, 1), jnp.float32)),
        in_specs=[vmem] * 4,
        out_specs=(vmem, vmem),
    )(c, h2, params["wa"], params["ba"])


# ---------------------------------------------------------------------------
# Forward wrapper
# ---------------------------------------------------------------------------
def gnn_norm_forward(x, edge_index, edge_weight, params, dropout_rng,
                     *, dropout_p=0.5):
    n, f_in = x.shape
    hidden = params["w1"].shape[1]
    n_pad = _round_up(n, 128)                  # padding decoupled from tiles

    a_bf16 = build_norm_adj(edge_index, edge_weight, n, n_pad).astype(jnp.bfloat16)
    x_bf16 = jnp.zeros((n_pad, f_in), jnp.bfloat16).at[:n, :].set(
        x.astype(jnp.bfloat16))
    drop_mask = make_dropout_mask(dropout_rng, n_pad, hidden, dropout_p)

    budget = _vmem_budget_bytes()
    a_bytes = n_pad * n_pad * 2                # bf16 A_hat
    if a_bytes + 16 * 1024 * 1024 <= budget:
        # Resident-A fusion: A read from HBM once; H1/H2/c stay in VMEM.
        # (~N<=4096 on v7x, ~N<=6400 on v5e/v6e with the 3/4 headroom.)
        choice_col, value = _fused_forward(a_bf16, x_bf16, params, drop_mask,
                                           n, budget)
    else:
        choice_col, value = _streaming_forward(a_bf16, x_bf16, params,
                                               drop_mask, n, budget)

    # (n_pad, 1) -> (n,): the only remaining wrapper-side copy (n_pad*4 bytes).
    return choice_col[:n, 0], value.reshape(())


# ---------------------------------------------------------------------------
# Parameters and pure-JAX f32 reference (for validation)
# ---------------------------------------------------------------------------
def init_params(key, d_in, hidden=16):
    """Glorot-uniform weights, zero GCN biases (PyG default)."""
    ks = jax.random.split(key, 5)

    def glorot(k, shape):
        lim = jnp.sqrt(6.0 / (shape[0] + shape[1]))
        return jax.random.uniform(k, shape, jnp.float32, -lim, lim)

    lim_lin = 1.0 / jnp.sqrt(float(hidden))
    return {
        "w1": glorot(ks[0], (d_in, hidden)),
        "b1": jnp.zeros((1, hidden), jnp.float32),
        "w2": glorot(ks[1], (hidden, hidden)),
        "b2": jnp.zeros((1, hidden), jnp.float32),
        "w3": glorot(ks[2], (hidden, 1)),
        "b3": jnp.zeros((1, 1), jnp.float32),
        # activ2: nn.Linear(hidden, 1)
        "wa": glorot(ks[3], (hidden, 1)),
        "ba": jax.random.uniform(ks[4], (1, 1), jnp.float32, -lim_lin, lim_lin),
        # TODO(synk): activ1 = nn.Linear(16, n_nodes) is defined in __init__ but
        # never used in forward(), so it is omitted here.
    }


def _reference_forward(x, a_hat, params, drop_mask, n):
    """f32 reference of the PyTorch forward (same dropout mask)."""
    h1 = jnp.maximum(a_hat @ x @ params["w1"] + params["b1"], 0.0) * drop_mask
    h2 = jnp.maximum(a_hat @ h1 @ params["w2"] + params["b2"], 0.0)
    c = a_hat @ h2 @ params["w3"] + params["b3"]
    choice = jax.nn.softmax(c[:, 0])
    v = jnp.mean(h2, axis=0, keepdims=True)
    value = (v @ params["wa"] + params["ba"]).reshape(())
    return choice, value


# ---------------------------------------------------------------------------
# Demo
# ---------------------------------------------------------------------------
if __name__ == "__main__":
    key = jax.random.PRNGKey(0)
    k_x, k_w, k_p, k_drop = jax.random.split(key, 4)

    n_nodes = 8            # args.n_nodes
    n_node_features = 4    # args.n_node_features

    # node features
    x = jax.random.normal(k_x, (n_nodes, n_node_features), jnp.float32)

    # ring graph (both directions), no pre-existing self loops
    src = jnp.arange(n_nodes, dtype=jnp.int32)
    dst = (src + 1) % n_nodes
    edge_index = jnp.stack([jnp.concatenate([src, dst]),
                            jnp.concatenate([dst, src])], axis=0)   # (2, 16)
    edge_weight = jax.random.uniform(k_w, (2 * n_nodes,), jnp.float32,
                                     0.5, 1.5)

    params = init_params(k_p, n_node_features)

    choice, value = gnn_norm_forward(x, edge_index, edge_weight, params, k_drop)
    jax.block_until_ready((choice, value))

    # pure-JAX f32 reference with the same dropout mask (bf16 tolerance)
    n_pad = _round_up(n_nodes, 128)
    hidden = params["w1"].shape[1]
    mask_ref = make_dropout_mask(k_drop, n_pad, hidden, 0.5)[:n_nodes]
    a_ref = build_norm_adj(edge_index, edge_weight, n_nodes, n_nodes)
    choice_ref, value_ref = _reference_forward(x, a_ref, params, mask_ref,
                                               n_nodes)

    assert choice.shape == (n_nodes,)
    assert value.shape == ()
    assert jnp.isfinite(choice).all() and jnp.isfinite(value)
    assert jnp.allclose(jnp.sum(choice), 1.0, atol=1e-4)
    assert jnp.allclose(choice, choice_ref, atol=5e-2, rtol=5e-2)
    assert jnp.allclose(value, value_ref, atol=5e-2, rtol=5e-2)

    print("KERNEL_OK")
</pallas_src>

<mosaic_0001>
module attributes {stable_mosaic.version = 11 : i64} {
  func.func @_fused_gnn_kernel(%arg0: memref<128x128xbf16, #tpu.memory_space<vmem>>, %arg1: memref<128x4xbf16, #tpu.memory_space<vmem>>, %arg2: memref<4x16xf32, #tpu.memory_space<vmem>>, %arg3: memref<1x16xf32, #tpu.memory_space<vmem>>, %arg4: memref<16x16xf32, #tpu.memory_space<vmem>>, %arg5: memref<1x16xf32, #tpu.memory_space<vmem>>, %arg6: memref<16x1xf32, #tpu.memory_space<vmem>>, %arg7: memref<1x1xf32, #tpu.memory_space<vmem>>, %arg8: memref<16x1xf32, #tpu.memory_space<vmem>>, %arg9: memref<1x1xf32, #tpu.memory_space<vmem>>, %arg10: memref<128x16xf32, #tpu.memory_space<vmem>>, %arg11: memref<128x1xf32, #tpu.memory_space<vmem>>, %arg12: memref<1x1xf32, #tpu.memory_space<vmem>>) attributes {dimension_semantics = [], scalar_prefetch = 0 : i64, scratch_operands = 0 : i64, tpu.core_type = #tpu.core_type<tc>} {
    %c0 = arith.constant 0 : index
    %c0_0 = arith.constant 0 : index
    %0 = vector.load %arg0[%c0, %c0_0] : memref<128x128xbf16, #tpu.memory_space<vmem>>, vector<128x128xbf16>
    %c0_1 = arith.constant 0 : index
    %c0_2 = arith.constant 0 : index
    %1 = vector.load %arg1[%c0_1, %c0_2] : memref<128x4xbf16, #tpu.memory_space<vmem>>, vector<128x4xbf16>
    %cst = arith.constant dense<0.000000e+00> : vector<128x4xf32>
    %2 = tpu.matmul %0, %1, %cst {dimension_numbers = #tpu.dot_dimension_numbers<[1], [0], [0], [1], [0, 0, 1, 1], [], []>} : vector<128x128xbf16>, vector<128x4xbf16>, vector<128x4xf32> -> vector<128x4xf32>
    %c0_3 = arith.constant 0 : index
    %c0_4 = arith.constant 0 : index
    %3 = vector.load %arg2[%c0_3, %c0_4] : memref<4x16xf32, #tpu.memory_space<vmem>>, vector<4x16xf32>
    %cst_5 = arith.constant dense<0.000000e+00> : vector<128x16xf32>
    %4 = tpu.matmul %2, %3, %cst_5 {dimension_numbers = #tpu.dot_dimension_numbers<[1], [0], [0], [1], [0, 0, 1, 1], [], []>} : vector<128x4xf32>, vector<4x16xf32>, vector<128x16xf32> -> vector<128x16xf32>
    %c0_6 = arith.constant 0 : index
    %c0_7 = arith.constant 0 : index
    %5 = vector.load %arg3[%c0_6, %c0_7] : memref<1x16xf32, #tpu.memory_space<vmem>>, vector<1x16xf32>
    %6 = vector.broadcast %5 : vector<1x16xf32> to vector<128x16xf32>
    %7 = arith.addf %4, %6 : vector<128x16xf32>
    %cst_8 = arith.constant 0.000000e+00 : f32
    %8 = vector.broadcast %cst_8 : f32 to vector<128x16xf32>
    %9 = arith.maximumf %7, %8 : vector<128x16xf32>
    %c0_9 = arith.constant 0 : index
    %c0_10 = arith.constant 0 : index
    %10 = vector.load %arg10[%c0_9, %c0_10] : memref<128x16xf32, #tpu.memory_space<vmem>>, vector<128x16xf32>
    %11 = arith.mulf %9, %10 : vector<128x16xf32>
    %12 = arith.truncf %11 : vector<128x16xf32> to vector<128x16xbf16>
    %cst_11 = arith.constant dense<0.000000e+00> : vector<128x16xf32>
    %13 = tpu.matmul %0, %12, %cst_11 {dimension_numbers = #tpu.dot_dimension_numbers<[1], [0], [0], [1], [0, 0, 1, 1], [], []>} : vector<128x128xbf16>, vector<128x16xbf16>, vector<128x16xf32> -> vector<128x16xf32>
    %c0_12 = arith.constant 0 : index
    %c0_13 = arith.constant 0 : index
    %14 = vector.load %arg4[%c0_12, %c0_13] : memref<16x16xf32, #tpu.memory_space<vmem>>, vector<16x16xf32>
    %cst_14 = arith.constant dense<0.000000e+00> : vector<128x16xf32>
    %15 = tpu.matmul %13, %14, %cst_14 {dimension_numbers = #tpu.dot_dimension_numbers<[1], [0], [0], [1], [0, 0, 1, 1], [], []>} : vector<128x16xf32>, vector<16x16xf32>, vector<128x16xf32> -> vector<128x16xf32>
    %c0_15 = arith.constant 0 : index
    %c0_16 = arith.constant 0 : index
    %16 = vector.load %arg5[%c0_15, %c0_16] : memref<1x16xf32, #tpu.memory_space<vmem>>, vector<1x16xf32>
    %17 = vector.broadcast %16 : vector<1x16xf32> to vector<128x16xf32>
    %18 = arith.addf %15, %17 : vector<128x16xf32>
    %cst_17 = arith.constant 0.000000e+00 : f32
    %19 = vector.broadcast %cst_17 : f32 to vector<128x16xf32>
    %20 = arith.maximumf %18, %19 : vector<128x16xf32>
    %21 = arith.truncf %20 : vector<128x16xf32> to vector<128x16xbf16>
    %cst_18 = arith.constant dense<0.000000e+00> : vector<128x16xf32>
    %22 = tpu.matmul %0, %21, %cst_18 {dimension_numbers = #tpu.dot_dimension_numbers<[1], [0], [0], [1], [0, 0, 1, 1], [], []>} : vector<128x128xbf16>, vector<128x16xbf16>, vector<128x16xf32> -> vector<128x16xf32>
    %c0_19 = arith.constant 0 : index
    %c0_20 = arith.constant 0 : index
    %23 = vector.load %arg6[%c0_19, %c0_20] : memref<16x1xf32, #tpu.memory_space<vmem>>, vector<16x1xf32>
    %cst_21 = arith.constant dense<0.000000e+00> : vector<128x1xf32>
    %24 = tpu.matmul %22, %23, %cst_21 {dimension_numbers = #tpu.dot_dimension_numbers<[1], [0], [0], [1], [0, 0, 1, 1], [], []>} : vector<128x16xf32>, vector<16x1xf32>, vector<128x1xf32> -> vector<128x1xf32>
    %c0_22 = arith.constant 0 : index
    %c0_23 = arith.constant 0 : index
    %25 = vector.load %arg7[%c0_22, %c0_23] : memref<1x1xf32, #tpu.memory_space<vmem>>, vector<1x1xf32>
    %26 = vector.broadcast %25 : vector<1x1xf32> to vector<128x1xf32>
    %27 = arith.addf %24, %26 : vector<128x1xf32>
    %c0_24 = arith.constant 0 : index
    %c0_25 = arith.constant 0 : index
    %28 = vector.load %arg8[%c0_24, %c0_25] : memref<16x1xf32, #tpu.memory_space<vmem>>, vector<16x1xf32>
    %c0_26 = arith.constant 0 : index
    %c0_27 = arith.constant 0 : index
    %29 = vector.load %arg9[%c0_26, %c0_27] : memref<1x1xf32, #tpu.memory_space<vmem>>, vector<1x1xf32>
    %30 = tpu.iota {dimensions = array<i32: 0>} : vector<128x1xi32>
    %c8_i32 = arith.constant 8 : i32
    %31 = vector.broadcast %c8_i32 : i32 to vector<128x1xi32>
    %32 = arith.cmpi slt, %30, %31 : vector<128x1xi32>
    %cst_28 = arith.constant 0xFF800000 : f32
    %33 = vector.broadcast %cst_28 : f32 to vector<128x1xf32>
    %34 = arith.select %32, %27, %33 : vector<128x1xi1>, vector<128x1xf32>
    %cst_29 = arith.constant dense<0xFF800000> : vector<1xf32>
    %35 = vector.multi_reduction <maximumf>, %34, %cst_29 [0] : vector<128x1xf32> to vector<1xf32>
    %36 = vector.shape_cast %35 : vector<1xf32> to vector<1x1xf32>
    %37 = vector.broadcast %36 : vector<1x1xf32> to vector<128x1xf32>
    %38 = arith.subf %34, %37 : vector<128x1xf32>
    %39 = math.exp %38 : vector<128x1xf32>
    %cst_30 = arith.constant dense<0.000000e+00> : vector<1xf32>
    %40 = vector.multi_reduction <add>, %39, %cst_30 [0] : vector<128x1xf32> to vector<1xf32>
    %41 = vector.shape_cast %40 : vector<1xf32> to vector<1x1xf32>
    %42 = vector.broadcast %41 : vector<1x1xf32> to vector<128x1xf32>
    %43 = arith.divf %39, %42 : vector<128x1xf32>
    %44 = tpu.iota {dimensions = array<i32: 0>} : vector<128x16xi32>
    %c8_i32_31 = arith.constant 8 : i32
    %45 = vector.broadcast %c8_i32_31 : i32 to vector<128x16xi32>
    %46 = arith.cmpi slt, %44, %45 : vector<128x16xi32>
    %cst_32 = arith.constant 0.000000e+00 : f32
    %47 = vector.broadcast %cst_32 : f32 to vector<128x16xf32>
    %48 = arith.select %46, %20, %47 : vector<128x16xi1>, vector<128x16xf32>
    %cst_33 = arith.constant dense<0.000000e+00> : vector<16xf32>
    %49 = vector.multi_reduction <add>, %48, %cst_33 [0] : vector<128x16xf32> to vector<16xf32>
    %50 = vector.shape_cast %49 : vector<16xf32> to vector<1x16xf32>
    %cst_34 = arith.constant 1.250000e-01 : f32
    %51 = vector.broadcast %cst_34 : f32 to vector<1x16xf32>
    %52 = arith.mulf %50, %51 : vector<1x16xf32>
    %cst_35 = arith.constant dense<0.000000e+00> : vector<1x1xf32>
    %53 = tpu.matmul %52, %28, %cst_35 {dimension_numbers = #tpu.dot_dimension_numbers<[1], [0], [0], [1], [0, 0, 1, 1], [], []>} : vector<1x16xf32>, vector<16x1xf32>, vector<1x1xf32> -> vector<1x1xf32>
    %54 = arith.addf %53, %29 : vector<1x1xf32>
    %c0_36 = arith.constant 0 : index
    %c0_37 = arith.constant 0 : index
    %55 = vector.load %arg11[%c0_36, %c0_37] : memref<128x1xf32, #tpu.memory_space<vmem>>, vector<128x1xf32>
    tpu.vector_store %arg11[%c0_36, %c0_37], %43 {strides = array<i32>} : memref<128x1xf32, #tpu.memory_space<vmem>>, vector<128x1xf32>,
    %c0_38 = arith.constant 0 : index
    %c0_39 = arith.constant 0 : index
    %56 = vector.load %arg12[%c0_38, %c0_39] : memref<1x1xf32, #tpu.memory_space<vmem>>, vector<1x1xf32>
    tpu.vector_store %arg12[%c0_38, %c0_39], %54 {strides = array<i32>} : memref<1x1xf32, #tpu.memory_space<vmem>>, vector<1x1xf32>,
    return
  }
}

</mosaic_0001>

<bundles_post_ra>
// kernel: tpu_custom_call.1
= control target key start
LH: loop header
LB: loop body
LE: loop exit
PB: predicated region body
PF: predicated region fallthrough
CT: control target
= control target key end

     0   :  { %s2316_s0 = inlined_call_operand.vmem [shape: bf16[128,128], index: 0, kind: input, shape index: {}]   ;;  %s2317_s1 = inlined_call_operand.vmem [shape: bf16[128,4], index: 1, kind: input, shape index: {}]   ;;  %s2318_s2 = inlined_call_operand.vmem [shape: f32[4,16], index: 2, kind: input, shape index: {}]   ;;  %s2319_s3 = inlined_call_operand.vmem [shape: f32[1,16], index: 3, kind: input, shape index: {}]   ;;  %s2320_s4 = inlined_call_operand.vmem [shape: f32[16,16], index: 4, kind: input, shape index: {}]   ;;  %s2321_s5 = inlined_call_operand.vmem [shape: f32[1,16], index: 5, kind: input, shape index: {}]   ;;  %s2322_s6 = inlined_call_operand.vmem [shape: f32[16,1], index: 6, kind: input, shape index: {}]   ;;  %s2323_s7 = inlined_call_operand.<no memory space> [shape: f32[1,1], index: 7, kind: input, shape index: {}]   ;;  %s2324_s8 = inlined_call_operand.vmem [shape: f32[16,1], index: 8, kind: input, shape index: {}]   ;;  %s2325_s10 = inlined_call_operand.vmem [shape: f32[128,16], index: 10, kind: input, shape index: {}]   ;;  %s2326_s11 = inlined_call_operand.vmem [shape: f32[128,1], index: 11, kind: output, shape index: {0}]   ;;  %s2327_s12 = inlined_call_operand.hbm [shape: f32[1,1], index: 12, kind: output, shape index: {1}]   ;;  %s2328_s9 = inlined_call_operand.<no memory space> [shape: f32[1,1], index: 9, kind: input, shape index: {}]  }
   0x1   :  { %v18_v0 = vstv %s2323_s7  ;;  %v20_v1 = vstv %s2328_s9 }
   0x2   :  { %19 = vst [vmem:[#allocation2] sm:$0x1] %v18_v0  ;;  %21 = vst [vmem:[#allocation3] sm:$0x1] %v20_v1 }
   0x3   :  { %v1876_v2 = vld [vmem:[%s2317_s1 + $0x38] sm:$0xff]   ;;  %v1877_v3 = vld [vmem:[%s2317_s1 + $0x30] sm:$0xff]   ;;  %v1878_v4 = vld [vmem:[%s2317_s1 + $0x28] sm:$0xff]  }
   0x4   :  { %1684 = vmatprep.subr.bf16.mxu0 %v1876_v2  ;;  %v1879_v5 = vld [vmem:[%s2317_s1 + $0x20] sm:$0xff]   ;;  %v1880_v7 = vld [vmem:[%s2317_s1 + $0x18] sm:$0xff]   ;;  %v1881_v8 = vld [vmem:[%s2317_s1 + $0x10] sm:$0xff]  }
   0x5   :  { %1685 = vmatpush3.bf16.msra.mxu0 %v1876_v2  ;;  %v2009_v6 = vld [vmem:[%s2316_s0] sm:$0xff]  }
   0x6   :  { %1686 = vmatprep.subr.bf16.mxu0 %v1877_v3  ;;  %1700 = vmatprep.mubr.bf16.mxu0 %v2009_v6 }
   0x9   :  { %1687 = vmatpush3.bf16.msra.mxu0 %v1877_v3 }
   0xa   :  { %1688 = vmatprep.subr.bf16.mxu0 %v1878_v4 }
   0xd   :  { %1689 = vmatpush3.bf16.msra.mxu0 %v1878_v4 }
   0xe   :  { %1690 = vmatprep.subr.bf16.mxu0 %v1879_v5 }
  0x11   :  { %1691 = vmatpush3.bf16.msra.mxu0 %v1879_v5 }
  0x12   :  { %1692 = vmatprep.subr.bf16.mxu0 %v1880_v7 }
  0x13   :  { %22 = vsyncpa [#allocation5], 0  ;;  %v1882_v9 = vld [vmem:[%s2317_s1 + $0x8] sm:$0xff]   ;;  %v1883_v10 = vld [vmem:[%s2317_s1] sm:$0xff]   ;;  %vm328_vm0 = vcmask 1043456   ;;  %vm279_vm1 = vcmask 31744  }
  0x14   :  { %v2027_v11 = vld [vmem:[%s2316_s0 + $0x8] sm:$0xff]   ;;  %v2032_v12 = vld [vmem:[%s2316_s0 + $0x10] sm:$0xff]   ;;  %v2039_v13 = vld [vmem:[%s2316_s0 + $0x18] sm:$0xff]   ;;  %vm639_vm2 = vcmask 130048   ;;  %vm1921_vm3 = vmmov 0   ;;  %vm1208_vm4 = vcmask 7168  }
  0x15   :  { %1693 = vmatpush3.bf16.msra.mxu0 %v1880_v7  ;;  %v2044_v14 = vld [vmem:[%s2316_s0 + $0x20] sm:$0xff]   ;;  %v2051_v15 = vld [vmem:[%s2316_s0 + $0x28] sm:$0xff]   ;;  %v2056_v16 = vld [vmem:[%s2316_s0 + $0x30] sm:$0xff]   ;;  %vm1491_vm5 = vcmask 0  }
  0x16   :  { %1694 = vmatprep.subr.bf16.mxu0 %v1881_v8  ;;  %v2063_v17 = vld [vmem:[%s2316_s0 + $0x38] sm:$0xff]   ;;  %v271_v18 = vld [vmem:[%s2318_s2] sm:$0xf]  ;;  %v631_v35 = vld [vmem:[%s2320_s4 + $0x8] sm:$0xff] }
  0x17   :  { %1716 = vmatprep.subr.msk.mxu1 %vm328_vm0, %v271_v18  ;;  %v630_v36 = vld [vmem:[%s2320_s4] sm:$0xff]  ;;  %v508_v62 = vld [vmem:[%s2325_s10 + $0x78] sm:$0xff]  ;;  %v507_v63 = vld [vmem:[%s2325_s10 + $0x70] sm:$0xff] }
  0x18   :  { %1717 = vmatpush3.msk.msra.mxu1 %vm328_vm0, %v271_v18  ;;  %v2101_v50 = vld [vmem:[%s2319_s3] ss:$0 sm:$0xff]  ;;  %v506_v4 = vld [vmem:[%s2325_s10 + $0x68] sm:$0xff] }
  0x19   :  { %1695 = vmatpush3.bf16.msra.mxu0 %v1881_v8  ;;  %v505_v61 = vld [vmem:[%s2325_s10 + $0x60] sm:$0xff] }
  0x1a   :  { %1696 = vmatprep.subr.bf16.mxu0 %v1882_v9 }
  0x1d   :  { %1697 = vmatpush3.bf16.msra.mxu0 %v1882_v9 }
  0x1e   :  { %1698 = vmatprep.subr.bf16.mxu0 %v1883_v10 }
  0x21   :  { %1699 = vmatpush3.bf16.msra.mxu0 %v1883_v10  ;;  %v503_v10 = vld [vmem:[%s2325_s10 + $0x50] sm:$0xff] }
  0x22   :  { %1774 = vmatprep.subr.mxu0 %v631_v35 }
  0x24   :  { %1701 = vmatmul.mubr.bf16.vlgmr.msra.gmra.mxu0 %v2027_v11 }
  0x25   :  { %1704 = vmatprep.mubr.bf16.mxu0 %v2032_v12  ;;  %1775 = vmatpush3.msra.mxu0 %v631_v35 }
  0x26   :  { %1776 = vmatprep.subr.mxu0 %v630_v36 }
  0x27   :  { %1777 = vmatpush3.msra.mxu0 %v630_v36  ;;  %v499_v36 = vld [vmem:[%s2325_s10 + $0x30] sm:$0xff] }
  0x2c   :  { %1705 = vmatmul.mubr.bf16.gmra.mxu0 %v2039_v13 }
  0x2d   :  { %1708 = vmatprep.mubr.bf16.mxu0 %v2044_v14 }
  0x34   :  { %1709 = vmatmul.mubr.bf16.gmra.mxu0 %v2051_v15 }
  0x35   :  { %1712 = vmatprep.mubr.bf16.mxu0 %v2056_v16 }
  0x3c   :  { %1713 = vmatmul.mubr.bf16.gmra.mxu0 %v2063_v17 }
  0xe4   :  { %v1702_v19 = vpop.f32.mrf.mxu0 }
  0xe6   :  { %v208_v20 = vpop.f32.mrf.mxu0 }
  0xe7   :  { %1718 = vmatprep.mubr.msk.f32.mxu1 %vm279_vm1, %v208_v20 }
  0xe8   :  { %v1703_v21 = vpop.f32.mrf.mxu0 }
  0xea   :  { %v211_v22 = vpop.f32.mrf.mxu0 }
  0xeb   :  { %1719 = vmatmul.mubr.msk.f32.vlgmr.msra.gmra.mxu1 %vm279_vm1, %v211_v22  ;;  %v504_v22 = vld [vmem:[%s2325_s10 + $0x58] sm:$0xff] }
  0xec   :  { %v1706_v23 = vpop.f32.mrf.mxu0  ;;  %1721 = vmatprep.mubr.msk.f32.mxu1 %vm279_vm1, %v1702_v19 }
  0xee   :  { %v224_v24 = vpop.f32.mrf.mxu0 }
  0xef   :  { %1722 = vmatmul.mubr.msk.f32.gmra.mxu1 %vm279_vm1, %v1703_v21 }
  0xf0   :  { %v1707_v25 = vpop.f32.mrf.mxu0  ;;  %1724 = vmatprep.mubr.msk.f32.mxu1 %vm279_vm1, %v224_v24 }
  0xf2   :  { %v227_v26 = vpop.f32.mrf.mxu0 }
  0xf3   :  { %1725 = vmatmul.mubr.msk.f32.gmra.mxu1 %vm279_vm1, %v227_v26 }
  0xf4   :  { %v1710_v27 = vpop.f32.mrf.mxu0  ;;  %1727 = vmatprep.mubr.msk.f32.mxu1 %vm279_vm1, %v1706_v23 }
  0xf6   :  { %v240_v28 = vpop.f32.mrf.mxu0 }
  0xf7   :  { %1728 = vmatmul.mubr.msk.f32.gmra.mxu1 %vm279_vm1, %v1707_v25 }
  0xf8   :  { %v1711_v29 = vpop.f32.mrf.mxu0  ;;  %1730 = vmatprep.mubr.msk.f32.mxu1 %vm279_vm1, %v240_v28 }
  0xfa   :  { %v243_v30 = vpop.f32.mrf.mxu0 }
  0xfb   :  { %1731 = vmatmul.mubr.msk.f32.gmra.mxu1 %vm279_vm1, %v243_v30 }
  0xfc   :  { %v1714_v31 = vpop.f32.mrf.mxu0  ;;  %1733 = vmatprep.mubr.msk.f32.mxu1 %vm279_vm1, %v1710_v27  ;;  %v501_v27 = vld [vmem:[%s2325_s10 + $0x40] sm:$0xff] }
  0xfe   :  { %v256_v32 = vpop.f32.mrf.mxu0 }
  0xff   :  { %1734 = vmatmul.mubr.msk.f32.gmra.mxu1 %vm279_vm1, %v1711_v29 }
 0x100   :  { %v1715_v33 = vpop.f32.mrf.mxu0  ;;  %1736 = vmatprep.mubr.msk.f32.mxu1 %vm279_vm1, %v256_v32 }
 0x102   :  { %v259_v34 = vpop.f32.mrf.mxu0 }
 0x103   :  { %1737 = vmatmul.mubr.msk.f32.gmra.mxu1 %vm279_vm1, %v259_v34 }
 0x104   :  { %1739 = vmatprep.mubr.msk.f32.mxu1 %vm279_vm1, %v1714_v31  ;;  %v502_v31 = vld [vmem:[%s2325_s10 + $0x48] sm:$0xff] }
 0x107   :  { %1740 = vmatmul.mubr.msk.f32.gmra.mxu1 %vm279_vm1, %v1715_v33 }
 0x108   :  { %1758 = vmatprep.mubr.bf16.mxu1 %v2009_v6 }
 0x1ab   :  { %v2092_v37 = vpop.f32.mrf.mxu1 }
 0x1ad   :  { %v2094_v38 = vpop.f32.mrf.mxu1 }
 0x1af   :  { %v2096_v39 = vpop.f32.mrf.mxu1 }
 0x1b1   :  { %v408_v40 = vpop.f32.mrf.mxu1 }
 0x1b3   :  { %v1726_v41 = vpop.f32.mrf.mxu1 }
 0x1b5   :  { %v418_v42 = vpop.f32.mrf.mxu1 }
 0x1b6   :  { %v419_v32 = vadd.f32 %v2101_v50, %v418_v42 }
 0x1b7   :  { %v1729_v43 = vpop.f32.mrf.mxu1 }
 0x1b8   :  { %v434_v28 = vadd.f32 %v1729_v43, %v2101_v50  ;;  %v481_v42 = vmax.f32 %v419_v32, 0.0 }
 0x1b9   :  { %v428_v44 = vpop.f32.mrf.mxu1 }
 0x1ba   :  { %v429_v23 = vadd.f32 %v2101_v50, %v428_v44  ;;  %v424_v44 = vadd.f32 %v1726_v41, %v2101_v50  ;;  %v484_v43 = vmax.f32 %v434_v28, 0.0  ;;  %v414_v41 = vadd.f32 %v2096_v39, %v2101_v50 }
 0x1bb   :  { %v1732_v45 = vpop.f32.mrf.mxu1  ;;  %v404_v39 = vadd.f32 %v2092_v37, %v2101_v50  ;;  %v494_v37 = vld [vmem:[%s2325_s10 + $0x8] sm:$0xff] }
 0x1bc   :  { %v444_v18 = vadd.f32 %v1732_v45, %v2101_v50  ;;  %v483_v33 = vmax.f32 %v429_v23, 0.0 }
 0x1bd   :  { %v438_v46 = vpop.f32.mrf.mxu1 }
 0x1be   :  { %v439_v3 = vadd.f32 %v2101_v50, %v438_v46  ;;  %v486_v29 = vmax.f32 %v444_v18, 0.0  ;;  %v500_v46 = vld [vmem:[%s2325_s10 + $0x38] sm:$0xff] }
 0x1bf   :  { %v1735_v47 = vpop.f32.mrf.mxu1 }
 0x1c0   :  { %v454_v0 = vadd.f32 %v1735_v47, %v2101_v50  ;;  %v485_v24 = vmax.f32 %v439_v3, 0.0  ;;  %v518_v45 = vmul.f32 %v502_v31, %v486_v29  ;;  %v409_v47 = vadd.f32 %v2101_v50, %v408_v40  ;;  %v2197_v29 = vld [vmem:[%s2322_s6 + $0x8] sm:$0xff] }
 0x1c1   :  { %v448_v48 = vpop.f32.mrf.mxu1  ;;  %v399_v40 = vadd.f32 %v2101_v50, %v2094_v38  ;;  %1834 = vmatprep.subr.mxu0 %v2197_v29 }
 0x1c2   :  { %v449_v57 = vadd.f32 %v2101_v50, %v448_v48  ;;  %v488_v19 = vmax.f32 %v454_v0, 0.0  ;;  %v517_v34 = vmul.f32 %v501_v27, %v485_v24  ;;  %v515_v48 = vmul.f32 %v499_v36, %v483_v33  ;;  %v493_v0 = vld [vmem:[%s2325_s10] sm:$0xff] }
 0x1c3   :  { %v1738_v49 = vpop.f32.mrf.mxu1 }
 0x1c4   :  { %v464_v54 = vadd.f32 %v1738_v49, %v2101_v50  ;;  %v487_v5 = vmax.f32 %v449_v57, 0.0  ;;  %v520_v30 = vmul.f32 %v504_v22, %v488_v19  ;;  %v529_v49 = vpack.c.bf16 %v518_v45, %v517_v34 }
 0x1c5   :  { %v458_v51 = vpop.f32.mrf.mxu1 }
 0x1c6   :  { %v459_v52 = vadd.f32 %v2101_v50, %v458_v51  ;;  %v490_v1 = vmax.f32 %v464_v54, 0.0  ;;  %v519_v25 = vmul.f32 %v503_v10, %v487_v5  ;;  %v497_v51 = vld [vmem:[%s2325_s10 + $0x20] sm:$0xff]  ;;  %v498_v54 = vld [vmem:[%s2325_s10 + $0x28] sm:$0xff] }
 0x1c7   :  { %v1741_v53 = vpop.f32.mrf.mxu1 }
 0x1c8   :  { %v474_v55 = vadd.f32 %v1741_v53, %v2101_v50  ;;  %v489_v58 = vmax.f32 %v459_v52, 0.0  ;;  %v522_v20 = vmul.f32 %v506_v4, %v490_v1  ;;  %v530_v35 = vpack.c.bf16 %v520_v30, %v519_v25  ;;  %v2202_v30 = vld [vmem:[%s2322_s6] sm:$0xff] }
 0x1c9   :  { %v468_v56 = vpop.f32.mrf.mxu1  ;;  %v482_v52 = vmax.f32 %v424_v44, 0.0  ;;  %v516_v53 = vmul.f32 %v500_v46, %v484_v43  ;;  %v478_v1 = vmax.f32 %v404_v39, 0.0 }
 0x1ca   :  { %v492_v59 = vmax.f32 %v474_v55, 0.0  ;;  %v469_v60 = vadd.f32 %v2101_v50, %v468_v56  ;;  %v521_v7 = vmul.f32 %v505_v61, %v489_v58  ;;  %v479_v55 = vmax.f32 %v409_v47, 0.0  ;;  %v495_v58 = vld [vmem:[%s2325_s10 + $0x10] sm:$0xff]  ;;  %v496_v61 = vld [vmem:[%s2325_s10 + $0x18] sm:$0xff] }
 0x1cb   :  { %v513_v56 = vmul.f32 %v497_v51, %v481_v42  ;;  %v528_v57 = vpack.c.bf16 %v516_v53, %v515_v48  ;;  %v510_v4 = vmul.f32 %v494_v37, %v478_v1  ;;  %v1545_v51 = vld [vmem:[%s2321_s5] ss:$0 sm:$0xff] }
 0x1cc   :  { %v491_v2 = vmax.f32 %v469_v60, 0.0  ;;  %v524_v8 = vmul.f32 %v508_v62, %v492_v59  ;;  %v531_v26 = vpack.c.bf16 %v522_v20, %v521_v7  ;;  %v480_v59 = vmax.f32 %v414_v41, 0.0 }
 0x1cd   :  { %v514_v60 = vmul.f32 %v498_v54, %v482_v52  ;;  %v477_v62 = vmax.f32 %v399_v40, 0.0  ;;  %v511_v38 = vmul.f32 %v495_v58, %v479_v55 }
 0x1ce   :  { %v523_v9 = vmul.f32 %v507_v63, %v491_v2  ;;  %v512_v2 = vmul.f32 %v496_v61, %v480_v59 }
 0x1cf   :  { %v527_v63 = vpack.c.bf16 %v514_v60, %v513_v56  ;;  %v509_v50 = vmul.f32 %v493_v0, %v477_v62 }
 0x1d0   :  { %v532_v21 = vpack.c.bf16 %v524_v8, %v523_v9  ;;  %v526_v3 = vpack.c.bf16 %v512_v2, %v511_v38 }
 0x1d1   :  { %v525_v5 = vpack.c.bf16 %v510_v4, %v509_v50 }
 0x1d2   :  { %1742 = vmatprep.subr.bf16.mxu1 %v532_v21 }
 0x1d3   :  { %1743 = vmatpush3.bf16.msra.mxu1 %v532_v21 }
 0x1d4   :  { %1744 = vmatprep.subr.bf16.mxu1 %v531_v26 }
 0x1d7   :  { %1745 = vmatpush3.bf16.msra.mxu1 %v531_v26 }
 0x1d8   :  { %1746 = vmatprep.subr.bf16.mxu1 %v530_v35 }
 0x1db   :  { %1747 = vmatpush3.bf16.msra.mxu1 %v530_v35 }
 0x1dc   :  { %1748 = vmatprep.subr.bf16.mxu1 %v529_v49 }
 0x1df   :  { %1749 = vmatpush3.bf16.msra.mxu1 %v529_v49 }
 0x1e0   :  { %1750 = vmatprep.subr.bf16.mxu1 %v528_v57 }
 0x1e3   :  { %1751 = vmatpush3.bf16.msra.mxu1 %v528_v57 }
 0x1e4   :  { %1752 = vmatprep.subr.bf16.mxu1 %v527_v63 }
 0x1e7   :  { %1753 = vmatpush3.bf16.msra.mxu1 %v527_v63 }
 0x1e8   :  { %1754 = vmatprep.subr.bf16.mxu1 %v526_v3 }
 0x1eb   :  { %1755 = vmatpush3.bf16.msra.mxu1 %v526_v3 }
 0x1ec   :  { %1756 = vmatprep.subr.bf16.mxu1 %v525_v5 }
 0x1ef   :  { %1757 = vmatpush3.bf16.msra.mxu1 %v525_v5 }
 0x1f2   :  { %1759 = vmatmul.mubr.bf16.vlgmr.msra.gmra.mxu1 %v2027_v11 }
 0x1f3   :  { %1762 = vmatprep.mubr.bf16.mxu1 %v2032_v12 }
 0x1fa   :  { %1763 = vmatmul.mubr.bf16.gmra.mxu1 %v2039_v13 }
 0x1fb   :  { %1766 = vmatprep.mubr.bf16.mxu1 %v2044_v14 }
 0x202   :  { %1767 = vmatmul.mubr.bf16.gmra.mxu1 %v2051_v15 }
 0x203   :  { %1770 = vmatprep.mubr.bf16.mxu1 %v2056_v16 }
 0x20a   :  { %1771 = vmatmul.mubr.bf16.gmra.mxu1 %v2063_v17 }
 0x20b   :  { %1818 = vmatprep.mubr.bf16.mxu1 %v2009_v6 }
 0x2b2   :  { %v1760_v7 = vpop.f32.mrf.mxu1 }
 0x2b4   :  { %v567_v8 = vpop.f32.mrf.mxu1 }
 0x2b5   :  { %1778 = vmatprep.mubr.msk.f32.mxu0 %vm639_vm2, %v567_v8 }
 0x2b6   :  { %v1761_v9 = vpop.f32.mrf.mxu1 }
 0x2b8   :  { %v570_v10 = vpop.f32.mrf.mxu1 }
 0x2b9   :  { %1779 = vmatmul.mubr.msk.f32.vlgmr.msra.gmra.mxu0 %vm639_vm2, %v570_v10 }
 0x2ba   :  { %v1764_v18 = vpop.f32.mrf.mxu1  ;;  %1781 = vmatprep.mubr.msk.f32.mxu0 %vm639_vm2, %v1760_v7  ;;  %1835 = vmatpush3.msra.mxu0 %v2197_v29 }
 0x2bb   :  { %1836 = vmatprep.subr.mxu0 %v2202_v30 }
 0x2bc   :  { %v583_v19 = vpop.f32.mrf.mxu1  ;;  %1837 = vmatpush3.msra.mxu0 %v2202_v30 }
 0x2bd   :  { %1782 = vmatmul.mubr.msk.f32.gmra.mxu0 %vm639_vm2, %v1761_v9 }
 0x2be   :  { %v1765_v20 = vpop.f32.mrf.mxu1  ;;  %1784 = vmatprep.mubr.msk.f32.mxu0 %vm639_vm2, %v583_v19 }
 0x2c0   :  { %v586_v21 = vpop.f32.mrf.mxu1 }
 0x2c1   :  { %1785 = vmatmul.mubr.msk.f32.gmra.mxu0 %vm639_vm2, %v586_v21 }
 0x2c2   :  { %v1768_v6 = vpop.f32.mrf.mxu1  ;;  %1787 = vmatprep.mubr.msk.f32.mxu0 %vm639_vm2, %v1764_v18 }
 0x2c4   :  { %v599_v22 = vpop.f32.mrf.mxu1 }
 0x2c5   :  { %1788 = vmatmul.mubr.msk.f32.gmra.mxu0 %vm639_vm2, %v1765_v20 }
 0x2c6   :  { %v1769_v23 = vpop.f32.mrf.mxu1  ;;  %1790 = vmatprep.mubr.msk.f32.mxu0 %vm639_vm2, %v599_v22 }
 0x2c8   :  { %v602_v24 = vpop.f32.mrf.mxu1 }
 0x2c9   :  { %1791 = vmatmul.mubr.msk.f32.gmra.mxu0 %vm639_vm2, %v602_v24 }
 0x2ca   :  { %v1772_v25 = vpop.f32.mrf.mxu1  ;;  %1793 = vmatprep.mubr.msk.f32.mxu0 %vm639_vm2, %v1768_v6 }
 0x2cc   :  { %v615_v26 = vpop.f32.mrf.mxu1 }
 0x2cd   :  { %1794 = vmatmul.mubr.msk.f32.gmra.mxu0 %vm639_vm2, %v1769_v23 }
 0x2ce   :  { %v1773_v27 = vpop.f32.mrf.mxu1  ;;  %1796 = vmatprep.mubr.msk.f32.mxu0 %vm639_vm2, %v615_v26 }
 0x2d0   :  { %v618_v28 = vpop.f32.mrf.mxu1 }
 0x2d1   :  { %1797 = vmatmul.mubr.msk.f32.gmra.mxu0 %vm639_vm2, %v618_v28 }
 0x2d2   :  { %1799 = vmatprep.mubr.msk.f32.mxu0 %vm639_vm2, %v1772_v25 }
 0x2d5   :  { %1800 = vmatmul.mubr.msk.f32.gmra.mxu0 %vm639_vm2, %v1773_v27 }
 0x379   :  { %v1780_v31 = vpop.f32.mrf.mxu0 }
 0x37a   :  { %v760_v25 = vadd.f32 %v1780_v31, %v1545_v51  ;;  %v1920_v31 = vmov 0.0  }
 0x37b   :  { %v754_v32 = vpop.f32.mrf.mxu0 }
 0x37c   :  { %v755_v22 = vadd.f32 %v1545_v51, %v754_v32 }
 0x37d   :  { %v1783_v33 = vpop.f32.mrf.mxu0 }
 0x37e   :  { %v770_v21 = vadd.f32 %v1783_v33, %v1545_v51  ;;  %v833_v27 = vmax.f32 %v755_v22, 0.0 }
 0x37f   :  { %v764_v34 = vpop.f32.mrf.mxu0 }
 0x380   :  { %v765_v18 = vadd.f32 %v1545_v51, %v764_v34  ;;  %v836_v26 = vmax.f32 %v770_v21, 0.0 }
 0x381   :  { %v1786_v35 = vpop.f32.mrf.mxu0 }
 0x382   :  { %v780_v9 = vadd.f32 %v1786_v35, %v1545_v51  ;;  %v835_v23 = vmax.f32 %v765_v18, 0.0  ;;  %v834_v35 = vmax.f32 %v760_v25, 0.0 }
 0x383   :  { %v774_v36 = vpop.f32.mrf.mxu0 }
 0x384   :  { %v775_v5 = vadd.f32 %v1545_v51, %v774_v36  ;;  %v838_v6 = vmax.f32 %v780_v9, 0.0  ;;  %v850_v28 = vpack.c.bf16 %v836_v26, %v835_v23  ;;  %v849_v36 = vpack.c.bf16 %v834_v35, %v833_v27  ;;  %v1158_v23 = vld [vmem:[#allocation3] sm:$0x1] }
 0x385   :  { %v1789_v44 = vpop.f32.mrf.mxu0 }
 0x386   :  { %v790_v3 = vadd.f32 %v1789_v44, %v1545_v51  ;;  %v837_v19 = vmax.f32 %v775_v5, 0.0 }
 0x387   :  { %v784_v43 = vpop.f32.mrf.mxu0 }
 0x388   :  { %v785_v2 = vadd.f32 %v1545_v51, %v784_v43  ;;  %v840_v10 = vmax.f32 %v790_v3, 0.0  ;;  %v851_v24 = vpack.c.bf16 %v838_v6, %v837_v19  ;;  %v1157_v43 = vld [vmem:[%s2324_s8 + $0x8] sm:$0xff] }
 0x389   :  { %v1792_v45 = vpop.f32.mrf.mxu0 }
 0x38a   :  { %v800_v0 = vadd.f32 %v1792_v45, %v1545_v51  ;;  %v839_v7 = vmax.f32 %v785_v2, 0.0 }
 0x38b   :  { %v794_v46 = vpop.f32.mrf.mxu0 }
 0x38c   :  { %v795_v62 = vadd.f32 %v1545_v51, %v794_v46  ;;  %v842_v4 = vmax.f32 %v800_v0, 0.0  ;;  %v852_v20 = vpack.c.bf16 %v840_v10, %v839_v7 }
 0x38d   :  { %v1795_v47 = vpop.f32.mrf.mxu0 }
 0x38e   :  { %v810_v59 = vadd.f32 %v1795_v47, %v1545_v51  ;;  %v841_v37 = vmax.f32 %v795_v62, 0.0  ;;  %v1156_v47 = vld [vmem:[%s2324_s8] sm:$0xff]  ;;  %s1922_s8 = smov [#allocation4]  }
 0x38f   :  { %v804_v42 = vpop.f32.mrf.mxu0  ;;  %s1501_s13 = sshll.u32 %s1922_s8, 4  ;;  %s1502_s13 = int_to_ptr.vmem [resolvable:$true] %s1501_s13 }
 0x390   :  { %v805_v56 = vadd.f32 %v1545_v51, %v804_v42  ;;  %v844_v1 = vmax.f32 %v810_v59, 0.0  ;;  %v853_v8 = vpack.c.bf16 %v842_v4, %v841_v37  ;;  %s1898_s14 = scalar_lea.vmem %s1502_s13, 16  ;;  %s1902_s15 = scalar_lea.vmem %s1502_s13, 32 }
 0x391   :  { %v1798_v48 = vpop.f32.mrf.mxu0  ;;  %p1899_p0 = scmp.ne.s32.totalorder %s1502_s13, %s1898_s14  ;;  %p1903_p1 = scmp.lt.s32.totalorder %s1502_s13, %s1502_s13 }
 0x392   :  { %v820_v40 = vadd.f32 %v1798_v48, %v1545_v51  ;;  %v843_v38 = vmax.f32 %v805_v56, 0.0  ;;  %v1562_v56 = vld [vmem:[#allocation2] ss:$0 sm:$0xff]  ;;  %p1904_p2 = scmp.lt.s32.totalorder %s1902_s15, %s1898_s14 }
 0x393   :  { %v814_v49 = vpop.f32.mrf.mxu0 }
 0x394   :  { %v815_v52 = vadd.f32 %v1545_v51, %v814_v49  ;;  %v846_v60 = vmax.f32 %v820_v40, 0.0  ;;  %v854_v50 = vpack.c.bf16 %v844_v1, %v843_v38  ;;  %p1905_p3 = por %p1904_p2, %p1903_p1 }
 0x395   :  { %v1801_v41 = vpop.f32.mrf.mxu0 }
 0x396   :  { %v830_v53 = vadd.f32 %v1801_v41, %v1545_v51  ;;  %v845_v57 = vmax.f32 %v815_v52, 0.0  ;;  %p1906_p4 = pnand %p1905_p3, %p1899_p0 }
 0x397   :  { %v824_v54 = vpop.f32.mrf.mxu0 }
 0x398   :  { %v825_v55 = vadd.f32 %v1545_v51, %v824_v54  ;;  %v848_v58 = vmax.f32 %v830_v53, 0.0  ;;  %v855_v63 = vpack.c.bf16 %v846_v60, %v845_v57 }
 0x39a   :  { %v847_v39 = vmax.f32 %v825_v55, 0.0 }
 0x39c   :  { %v856_v61 = vpack.c.bf16 %v848_v58, %v847_v39 }
 0x39e   :  { %1802 = vmatprep.subr.bf16.mxu1 %v856_v61 }
 0x39f   :  { %1803 = vmatpush3.bf16.msra.mxu1 %v856_v61 }
 0x3a0   :  { %1804 = vmatprep.subr.bf16.mxu1 %v855_v63 }
 0x3a3   :  { %1805 = vmatpush3.bf16.msra.mxu1 %v855_v63 }
 0x3a4   :  { %1806 = vmatprep.subr.bf16.mxu1 %v854_v50 }
 0x3a7   :  { %1807 = vmatpush3.bf16.msra.mxu1 %v854_v50 }
 0x3a8   :  { %1808 = vmatprep.subr.bf16.mxu1 %v853_v8 }
 0x3ab   :  { %1809 = vmatpush3.bf16.msra.mxu1 %v853_v8 }
 0x3ac   :  { %1810 = vmatprep.subr.bf16.mxu1 %v852_v20 }
 0x3af   :  { %1811 = vmatpush3.bf16.msra.mxu1 %v852_v20 }
 0x3b0   :  { %1812 = vmatprep.subr.bf16.mxu1 %v851_v24 }
 0x3b3   :  { %1813 = vmatpush3.bf16.msra.mxu1 %v851_v24 }
 0x3b4   :  { %1814 = vmatprep.subr.bf16.mxu1 %v850_v28 }
 0x3b7   :  { %1815 = vmatpush3.bf16.msra.mxu1 %v850_v28 }
 0x3b8   :  { %1816 = vmatprep.subr.bf16.mxu1 %v849_v36 }
 0x3bb   :  { %1817 = vmatpush3.bf16.msra.mxu1 %v849_v36 }
 0x3bc   :  { %1869 = vmatprep.subr.mxu1 %v2197_v29 }
 0x3be   :  { %1819 = vmatmul.mubr.bf16.vlgmr.msra.gmra.mxu1 %v2027_v11 }
 0x3bf   :  { %1822 = vmatprep.mubr.bf16.mxu1 %v2032_v12  ;;  %1871 = vmatpush3.msra.mxu1 %v2197_v29 }
 0x3c0   :  { %1870 = vmatprep.subr.mxu1 %v2202_v30 }
 0x3c1   :  { %1872 = vmatpush3.msra.mxu1 %v2202_v30 }
 0x3c2   :  { %1862 = vmatprep.subr.mxu1 %v1920_v31 }
 0x3c6   :  { %1823 = vmatmul.mubr.bf16.gmra.mxu1 %v2039_v13  ;;  %v1364_v13 = vsel %vm639_vm2, %v833_v27, 0.0 }
 0x3c7   :  { %1826 = vmatprep.mubr.bf16.mxu1 %v2044_v14 }
 0x3ce   :  { %1827 = vmatmul.mubr.bf16.gmra.mxu1 %v2051_v15 }
 0x3cf   :  { %1830 = vmatprep.mubr.bf16.mxu1 %v2056_v16  ;;  %v1395_v16 = vrot.slane %v1364_v13, 4 }
 0x3d1   :  { %v1396_v34 = vadd.f32 %v1395_v16, %v1364_v13 }
 0x3d3   :  { %v1397_v46 = vrot.slane %v1396_v34, 2 }
 0x3d5   :  { %v1398_v49 = vadd.f32 %v1397_v46, %v1396_v34 }
 0x3d6   :  { %1831 = vmatmul.mubr.bf16.gmra.mxu1 %v2063_v17 }
 0x3d7   :  { %v1399_v52 = vrot.slane %v1398_v49, 1 }
 0x3d9   :  { %v1400_v54 = vadd.f32 %v1399_v52, %v1398_v49 }
 0x3db   :  { %v1401_v40 = vmul.f32 0.125, %v1400_v54 }
 0x47e   :  { %v1820_v11 = vpop.f32.mrf.mxu1 }
 0x480   :  { %v891_v12 = vpop.f32.mrf.mxu1 }
 0x481   :  { %1838 = vmatprep.mubr.msk.f32.mxu0 %vm639_vm2, %v891_v12 }
 0x482   :  { %v1821_v29 = vpop.f32.mrf.mxu1 }
 0x484   :  { %v894_v32 = vpop.f32.mrf.mxu1 }
 0x485   :  { %1839 = vmatmul.mubr.msk.f32.vlgmr.msra.gmra.mxu0 %vm639_vm2, %v894_v32 }
 0x486   :  { %v1824_v30 = vpop.f32.mrf.mxu1  ;;  %1841 = vmatprep.mubr.msk.f32.mxu0 %vm639_vm2, %v1820_v11 }
 0x488   :  { %v907_v14 = vpop.f32.mrf.mxu1 }
 0x489   :  { %1842 = vmatmul.mubr.msk.f32.gmra.mxu0 %vm639_vm2, %v1821_v29 }
 0x48a   :  { %v1825_v15 = vpop.f32.mrf.mxu1  ;;  %1844 = vmatprep.mubr.msk.f32.mxu0 %vm639_vm2, %v907_v14 }
 0x48c   :  { %v910_v17 = vpop.f32.mrf.mxu1 }
 0x48d   :  { %1845 = vmatmul.mubr.msk.f32.gmra.mxu0 %vm639_vm2, %v910_v17 }
 0x48e   :  { %v1828_v33 = vpop.f32.mrf.mxu1  ;;  %1847 = vmatprep.mubr.msk.f32.mxu0 %vm639_vm2, %v1824_v30 }
 0x48f   :  { %1853 = vmatprep.mubr.msk.f32.mxu1 %vm639_vm2, %v1828_v33 }
 0x490   :  { %v923_v44 = vpop.f32.mrf.mxu1 }
 0x491   :  { %1848 = vmatmul.mubr.msk.f32.gmra.mxu0 %vm639_vm2, %v1825_v15 }
 0x492   :  { %v1829_v45 = vpop.f32.mrf.mxu1  ;;  %1850 = vmatprep.mubr.msk.f32.mxu0 %vm639_vm2, %v923_v44 }
 0x493   :  { %1854 = vmatmul.mubr.msk.f32.vlgmr.msra.gmra.mxu1 %vm639_vm2, %v1829_v45 }
 0x494   :  { %v926_v42 = vpop.f32.mrf.mxu1  ;;  %1863 = vmatpush3.msra.mxu1 %v1157_v43 }
 0x495   :  { %1864 = vmatprep.subr.mxu1 %v1920_v31  ;;  %1851 = vmatmul.mubr.msk.f32.gmra.mxu0 %vm639_vm2, %v926_v42 }
 0x496   :  { %v1832_v48 = vpop.f32.mrf.mxu1  ;;  %1865 = vmatpush3.msra.mxu1 %v1156_v47 }
 0x498   :  { %v939_v51 = vpop.f32.mrf.mxu1 }
 0x499   :  { %1856 = vmatprep.mubr.msk.f32.mxu1 %vm639_vm2, %v939_v51 }
 0x49a   :  { %v1833_v41 = vpop.f32.mrf.mxu1 }
 0x49c   :  { %v942_v53 = vpop.f32.mrf.mxu1 }
 0x49d   :  { %1857 = vmatmul.mubr.msk.f32.gmra.mxu1 %vm639_vm2, %v942_v53 }
 0x49e   :  { %1859 = vmatprep.mubr.msk.f32.mxu1 %vm639_vm2, %v1832_v48 }
 0x4a1   :  { %1860 = vmatmul.mubr.msk.f32.gmra.mxu1 %vm639_vm2, %v1833_v41 }
 0x4a2   :  { %1866 = vmatprep.mubr.msk.f32.mxu1 %vm1921_vm3, %v1920_v31 }
 0x4a5   :  { %1867 = vmatmul.mubr.msk.f32.vlgmr.msra.gmra.mxu1 %vm639_vm2, %v1401_v40 }
 0x545   :  { %v1840_v55 = vpop.f32.mrf.mxu0 }
 0x547   :  { %v1077_v57 = vpop.f32.mrf.mxu0 }
 0x548   :  { %v1078_v58 = vadd.f32 %v1562_v56, %v1077_v57 }
 0x549   :  { %v1843_v39 = vpop.f32.mrf.mxu0 }
 0x54a   :  { %v1209_v59 = vsel %vm1208_vm4, %v1078_v58, -inf }
 0x54b   :  { %v1240_v60 = vrot.slane %v1209_v59, 4  ;;  %v1087_v61 = vpop.f32.mrf.mxu0 }
 0x54d   :  { %v1241_v62 = vmax.f32 %v1209_v59, %v1240_v60  ;;  %v1846_v38 = vpop.f32.mrf.mxu0 }
 0x54f   :  { %v1242_v63 = vrot.slane %v1241_v62, 2  ;;  %v1097_v0 = vpop.f32.mrf.mxu0 }
 0x551   :  { %v1243_v1 = vmax.f32 %v1241_v62, %v1242_v63  ;;  %v1849_v2 = vpop.f32.mrf.mxu0 }
 0x553   :  { %v1244_v37 = vrot.slane %v1243_v1, 1  ;;  %v1855_v50 = vpop.f32.mrf.mxu1  ;;  %v1107_v3 = vpop.f32.mrf.mxu0 }
 0x555   :  { %v1245_v4 = vmax.f32 %v1243_v1, %v1244_v37  ;;  %v1127_v5 = vpop.f32.mrf.mxu1  ;;  %v1852_v7 = vpop.f32.mrf.mxu0 }
 0x557   :  { %v1246_v8 = vsub.f32 %v1078_v58, %v1245_v4  ;;  %v1247_v9 = vsub.f32 -inf, %v1245_v4  ;;  %v1117_v10 = vpop.f32.mrf.mxu0 }
 0x559   :  { %v1262_v18 = vmul.f32 1.442695, %v1246_v8  ;;  %v1264_v19 = vmul.f32 1.442695, %v1247_v9 }
 0x55b   :  { %1892 = vpow2.f32 %v1262_v18 }
 0x55c   :  { %1894 = vpow2.f32 %v1264_v19 }
 0x55d   :  { %v1858_v20 = vpop.f32.mrf.mxu1 }
 0x55f   :  { %v1137_v21 = vpop.f32.mrf.mxu1 }
 0x561   :  { %v1861_v6 = vpop.f32.mrf.mxu1 }
 0x563   :  { %v1147_v22 = vpop.f32.mrf.mxu1 }
 0x565   :  { %v1471_v24 = vpop.f32.mrf.mxu1 }
 0x566   :  { %v1472_v25 = vadd.f32 %v1471_v24, %v1158_v23 }
 0x567   :  { %v1868_v26 = vpop.f32.mrf.mxu1 }
 0x568   :  { %v1893_v27 = vpop.eup %1892  ;;  %1492 = vst.msk [vmem:[#allocation4] sm:$0x1] %vm1491_vm5, %v1472_v25 }
 0x569   :  { %v1895_v28 = vpop.eup %1894  ;;  %v1294_v35 = vsel %vm1208_vm4, %v1893_v27, 0.0 }
 0x56a   :  { %1909 = shalt.err (!%p1906_p4)
}
 0x56b   :  { %1504 = dma.vmem_to_hbm [thread:$0]  %s1502_s13, 16, %s2327_s12, [#allocation5]   ;;  %v1295_v36 = vsel %vm1208_vm4, %v1895_v28, 0.0 }
 0x56c   :  { %v1296_v31 = vadd.f32 %v1295_v36, %v1294_v35 }
 0x56e   :  { %v1298_v11 = vadd.f32 %v1296_v31, %v1295_v36 }
 0x570   :  { %v1300_v12 = vadd.f32 %v1298_v11, %v1295_v36 }
 0x572   :  { %v1302_v29 = vadd.f32 %v1300_v12, %v1295_v36 }
 0x574   :  { %v1304_v32 = vadd.f32 %v1302_v29, %v1295_v36 }
 0x576   :  { %v1306_v30 = vadd.f32 %v1304_v32, %v1295_v36 }
 0x578   :  { %v1308_v13 = vadd.f32 %v1306_v30, %v1295_v36 }
 0x57a   :  { %v1310_v14 = vadd.f32 %v1308_v13, %v1295_v36 }
 0x57c   :  { %v1312_v15 = vadd.f32 %v1310_v14, %v1295_v36 }
 0x57e   :  { %v1314_v16 = vadd.f32 %v1312_v15, %v1295_v36 }
 0x580   :  { %v1316_v17 = vadd.f32 %v1314_v16, %v1295_v36 }
 0x582   :  { %v1318_v33 = vadd.f32 %v1316_v17, %v1295_v36 }
 0x584   :  { %v1320_v34 = vadd.f32 %v1318_v33, %v1295_v36 }
 0x586   :  { %v1322_v44 = vadd.f32 %v1320_v34, %v1295_v36 }
 0x588   :  { %v1324_v43 = vadd.f32 %v1322_v44, %v1295_v36 }
 0x58a   :  { %v1325_v45 = vrot.slane %v1324_v43, 4 }
 0x58c   :  { %v1326_v46 = vadd.f32 %v1325_v45, %v1324_v43 }
 0x58e   :  { %v1327_v47 = vrot.slane %v1326_v46, 2 }
 0x590   :  { %v1328_v42 = vadd.f32 %v1327_v47, %v1326_v46 }
 0x592   :  { %v1329_v48 = vrot.slane %v1328_v42, 1 }
 0x594   :  { %v1330_v49 = vadd.f32 %v1329_v48, %v1328_v42 }
 0x596   :  { %1896 = vrcp.f32 %v1330_v49 }
 0x5a3   :  { %v1897_v51 = vpop.eup %1896 }
 0x5a4   :  { %v1332_v41 = vmul.f32 %v1897_v51, %v1893_v27  ;;  %v1333_v52 = vmul.f32 %v1897_v51, %v1895_v28 }
 0x5a6   :  { %1475 = vst.msk [vmem:[%s2326_s11] sm:$0xff] %vm1208_vm4, %v1332_v41  ;;  %1476 = vst.msk [vmem:[%s2326_s11 + $0x8] sm:$0xff] %vm1208_vm4, %v1333_v52 }
 0x5a7   :  { %1477 = vst.msk [vmem:[%s2326_s11 + $0x10] sm:$0xff] %vm1208_vm4, %v1333_v52  ;;  %1478 = vst.msk [vmem:[%s2326_s11 + $0x18] sm:$0xff] %vm1208_vm4, %v1333_v52 }
 0x5a8   :  { %1479 = vst.msk [vmem:[%s2326_s11 + $0x20] sm:$0xff] %vm1208_vm4, %v1333_v52  ;;  %1480 = vst.msk [vmem:[%s2326_s11 + $0x28] sm:$0xff] %vm1208_vm4, %v1333_v52 }
 0x5a9   :  { %1481 = vst.msk [vmem:[%s2326_s11 + $0x30] sm:$0xff] %vm1208_vm4, %v1333_v52  ;;  %1482 = vst.msk [vmem:[%s2326_s11 + $0x38] sm:$0xff] %vm1208_vm4, %v1333_v52 }
 0x5aa   :  { %1483 = vst.msk [vmem:[%s2326_s11 + $0x40] sm:$0xff] %vm1208_vm4, %v1333_v52  ;;  %1484 = vst.msk [vmem:[%s2326_s11 + $0x48] sm:$0xff] %vm1208_vm4, %v1333_v52 }
 0x5ab   :  { %1485 = vst.msk [vmem:[%s2326_s11 + $0x50] sm:$0xff] %vm1208_vm4, %v1333_v52  ;;  %1486 = vst.msk [vmem:[%s2326_s11 + $0x58] sm:$0xff] %vm1208_vm4, %v1333_v52 }
 0x5ac   :  { %1487 = vst.msk [vmem:[%s2326_s11 + $0x60] sm:$0xff] %vm1208_vm4, %v1333_v52  ;;  %1488 = vst.msk [vmem:[%s2326_s11 + $0x68] sm:$0xff] %vm1208_vm4, %v1333_v52 }
 0x5ad   :  { %1489 = vst.msk [vmem:[%s2326_s11 + $0x70] sm:$0xff] %vm1208_vm4, %v1333_v52  ;;  %1490 = vst.msk [vmem:[%s2326_s11 + $0x78] sm:$0xff] %vm1208_vm4, %v1333_v52 }
 0x5ae   :  { %1918 = dma.done.wait [#allocation5], 16  }
 0x5af   :  { %1919 = vsyncadd [#allocation5], 4294967280 }
 0x5b0   :  { %1510 = vsyncpa [#allocation5], 1 }

</bundles_post_ra>
